<compile_context>
chip_gen: v7x
topology: tpu7x:2x2x1
jax: 0.10.0
libtpu: 0.0.40
codegen_flags: <defaults>
</compile_context>

<pallas_src>
import functools

import jax
import jax.numpy as jnp
import numpy as np
from jax.experimental import pallas as pl
from jax.experimental.pallas import tpu as pltpu

# ---------------------------------------------------------------------------
# Irreps definition: list of (mul, l, parity).  Equivalent to "8x0e + 4x1o + 2x2e".
# ---------------------------------------------------------------------------
IRREPS = [(8, 0, 1), (4, 1, -1), (2, 2, 1)]
EPS = 1e-6


def _irreps_struct(irreps):
    """Pre-compute (start, size, mul, ir_dim, is_scalar) like _setup_indices_and_shapes."""
    struct = []
    idx = 0
    for mul, l, p in irreps:
        ir_dim = 2 * l + 1
        size = mul * ir_dim
        is_scalar = (l == 0 and p == 1)
        struct.append((idx, size, mul, ir_dim, is_scalar))
        idx += size
    return struct, idx


STRUCT, IRREPS_DIM = _irreps_struct(IRREPS)
N_IRREPS = len(STRUCT)
N_SCALAR = sum(1 for s in STRUCT if s[4])


# ---------------------------------------------------------------------------
# Static gather / scatter matrices for a fold factor G (G logical rows packed
# into one physical row of D_fold = G * IRREPS_DIM lanes).
#   gather_x  : (D_fold, nS*G)  weighted 1/size  -> per-segment scalar mean
#   gather_sq : (D_fold, nI*G)  weighted 1/size (scalar) or 1/mul (non-scalar)
#                               -> E[x^2] / mean_norm2 per irrep per segment
#   scatter_c : (nS*G, D_fold)  0/1, broadcasts the scalar mean back to its lanes
#   scatter_s : (nI*G, D_fold)  0/1, broadcasts each irrep's inverse scale back
# All entries (0, 1, 1/8, 1/4, 1/2) are exactly representable.
# ---------------------------------------------------------------------------
@functools.lru_cache(maxsize=None)
def _fold_matrices(G: int):
    D = IRREPS_DIM
    D_fold = D * G
    ind = np.zeros((D_fold, N_IRREPS * G), np.float32)
    gather_sq = np.zeros((D_fold, N_IRREPS * G), np.float32)
    ind_x = np.zeros((D_fold, max(N_SCALAR, 1) * G), np.float32)
    gather_x = np.zeros((D_fold, max(N_SCALAR, 1) * G), np.float32)
    si = 0
    for i, (start, size, mul, _ir_dim, is_scalar) in enumerate(STRUCT):
        w = (1.0 / size) if is_scalar else (1.0 / mul)
        for g in range(G):
            lo = g * D + start
            ind[lo:lo + size, i * G + g] = 1.0
            gather_sq[lo:lo + size, i * G + g] = w
            if is_scalar:
                ind_x[lo:lo + size, si * G + g] = 1.0
                gather_x[lo:lo + size, si * G + g] = 1.0 / size
        if is_scalar:
            si += 1
    scatter_s = np.ascontiguousarray(ind.T)      # (nI*G, D_fold)
    scatter_c = np.ascontiguousarray(ind_x.T)    # (nS*G, D_fold)
    return (jnp.asarray(gather_x), jnp.asarray(gather_sq),
            jnp.asarray(scatter_c), jnp.asarray(scatter_s))


# ---------------------------------------------------------------------------
# Kernel: one (tile, G*D) block of folded rows per grid step.
# ---------------------------------------------------------------------------
@functools.lru_cache(maxsize=None)
def _make_kernel(G: int):

    def kernel(x_ref, gx_ref, gs_ref, sc_ref, ss_ref, o_ref):
        x = x_ref[...].astype(jnp.float32)        # (T, G*D) — ~94% lane occupancy
        sq = x * x                                 # single full-width square

        # Per-segment / per-irrep statistics on the (otherwise idle) MXU.
        ex = jnp.dot(x, gx_ref[...], preferred_element_type=jnp.float32)    # (T, nS*G) scalar means
        ex2 = jnp.dot(sq, gs_ref[...], preferred_element_type=jnp.float32)  # (T, nI*G) E[x^2]/mean|x|^2

        inv_parts, mean_parts = [], []
        si = 0
        for i, (_start, _size, _mul, _dim, is_scalar) in enumerate(STRUCT):
            cols = ex2[:, i * G:(i + 1) * G]
            if is_scalar:
                mean = ex[:, si * G:(si + 1) * G]
                var = jnp.maximum(cols - mean * mean, 0.0)   # E[x^2] - mean^2 (biased var)
                inv_parts.append(jax.lax.rsqrt(var + EPS))
                mean_parts.append(mean)
                si += 1
            else:
                inv_parts.append(jax.lax.rsqrt(cols + EPS))

        inv_all = inv_parts[0] if len(inv_parts) == 1 else jnp.concatenate(inv_parts, axis=-1)
        # Broadcast narrow per-irrep stats back to all lanes via scatter matmuls.
        scale = jnp.dot(inv_all, ss_ref[...], preferred_element_type=jnp.float32)  # (T, G*D)
        if mean_parts:
            mean_all = mean_parts[0] if len(mean_parts) == 1 else jnp.concatenate(mean_parts, axis=-1)
            center = jnp.dot(mean_all, sc_ref[...], preferred_element_type=jnp.float32)
            out = (x - center) * scale
        else:
            out = x * scale

        o_ref[...] = out.astype(o_ref.dtype)       # lane-dense full-block store

    return kernel


def _sublane_multiple(dtype):
    itemsize = jnp.dtype(dtype).itemsize
    return {4: 8, 2: 16, 1: 32}.get(itemsize, 8)


# ---------------------------------------------------------------------------
# Wrapper
# ---------------------------------------------------------------------------
def equivariant_layer_norm(x, *, rows_per_block=8192):
    """Apply the irreps LayerNorm to x of shape [..., IRREPS_DIM]."""
    assert x.shape[-1] == IRREPS_DIM, (x.shape, IRREPS_DIM)
    batch_dims = x.shape[:-1]
    n = int(np.prod(batch_dims)) if batch_dims else 1
    x2 = x.reshape(n, IRREPS_DIM)

    # Fold G logical rows into one physical row (free row-major metadata reshape).
    if n % 8 == 0:
        G, n_pad = 8, n
    elif n % 4 == 0:
        G, n_pad = 4, n
    else:
        G = 8
        n_pad = ((n + G - 1) // G) * G
        x2 = jnp.pad(x2, ((0, n_pad - n), (0, 0)))   # rare fallback; padded rows are sliced off

    D_fold = IRREPS_DIM * G
    rows_f = n_pad // G
    xf = x2.reshape(rows_f, D_fold)

    gx, gs, sc, ss = _fold_matrices(G)

    # Folded-row tile: ~rows_per_block logical rows per grid step (amortizes the
    # ~0.35 us per-step overhead; ~1 MB/block so VMEM stays small on every chip).
    sub = _sublane_multiple(x.dtype)
    tile = max(sub, ((rows_per_block // G) // sub) * sub)
    if rows_f <= tile:
        tile = rows_f                 # single full block (full-dim blocks are always legal)
    grid = pl.cdiv(rows_f, tile)      # ragged final block handled by Pallas (rows independent)

    out = pl.pallas_call(
        _make_kernel(G),
        out_shape=jax.ShapeDtypeStruct((rows_f, D_fold), x.dtype),
        grid=(grid,),
        in_specs=[
            pl.BlockSpec((tile, D_fold), lambda i: (i, 0)),
            pl.BlockSpec(gx.shape, lambda i: (0, 0)),   # constants: fetched once, resident
            pl.BlockSpec(gs.shape, lambda i: (0, 0)),
            pl.BlockSpec(sc.shape, lambda i: (0, 0)),
            pl.BlockSpec(ss.shape, lambda i: (0, 0)),
        ],
        out_specs=pl.BlockSpec((tile, D_fold), lambda i: (i, 0)),
        compiler_params=pltpu.CompilerParams(dimension_semantics=("parallel",)),
    )(xf, gx, gs, sc, ss)

    out = out.reshape(n_pad, IRREPS_DIM)
    if n_pad != n:
        out = out[:n]
    return out.reshape(*batch_dims, IRREPS_DIM)


# ---------------------------------------------------------------------------
# Pure-JAX reference (mirrors the PyTorch forward) for verification.
# ---------------------------------------------------------------------------
def _reference(x):
    batch_dims = x.shape[:-1]
    outs = []
    for (start, size, mul, ir_dim, is_scalar) in STRUCT:
        field = x[..., start:start + size]
        fv = field.reshape(*batch_dims, mul, ir_dim)
        if is_scalar:
            flat = fv.reshape(*batch_dims, mul * ir_dim)
            mean = jnp.mean(flat, axis=-1, keepdims=True)
            var = jnp.mean((flat - mean) ** 2, axis=-1, keepdims=True)
            out = (flat - mean) * jax.lax.rsqrt(var + EPS)
            outs.append(out.reshape(*batch_dims, size))
        else:
            norm2 = jnp.sum(fv ** 2, axis=-1)
            mean_norm2 = jnp.mean(norm2, axis=-1, keepdims=True)
            inv = jax.lax.rsqrt(mean_norm2 + EPS)[..., None]
            outs.append((fv * inv).reshape(*batch_dims, size))
    return jnp.concatenate(outs, axis=-1)


if __name__ == "__main__":
    key = jax.random.PRNGKey(0)
    k1, k2, k3 = jax.random.split(key, 3)

    # 1) Small, nicely divisible batch: n = 4*32 = 128 rows (G=8 fold, single block).
    x1 = jax.random.normal(k1, (4, 32, IRREPS_DIM), dtype=jnp.float32)
    y1 = jax.block_until_ready(equivariant_layer_norm(x1))
    np.testing.assert_allclose(np.asarray(y1), np.asarray(_reference(x1)),
                               rtol=1e-4, atol=1e-5)

    # 2) Multi-block grid with a ragged final block: n = 3*40 = 120 rows -> 15 folded
    #    rows, 8-row tile -> grid of 2 (second block partial).
    x2 = jax.random.normal(k2, (3, 40, IRREPS_DIM), dtype=jnp.float32)
    y2 = jax.block_until_ready(equivariant_layer_norm(x2, rows_per_block=64))
    np.testing.assert_allclose(np.asarray(y2), np.asarray(_reference(x2)),
                               rtol=1e-4, atol=1e-5)

    # 3) Row count not divisible by 4: exercises the cheap pad-to-fold fallback.
    x3 = jax.random.normal(k3, (123, IRREPS_DIM), dtype=jnp.float32)
    y3 = jax.block_until_ready(equivariant_layer_norm(x3))
    np.testing.assert_allclose(np.asarray(y3), np.asarray(_reference(x3)),
                               rtol=1e-4, atol=1e-5)

    print("KERNEL_OK")
</pallas_src>

<mosaic_0001>
module attributes {stable_mosaic.version = 11 : i64} {
  func.func @kernel(%arg0: i32, %arg1: memref<16x240xf32, #tpu.memory_space<vmem>>, %arg2: memref<240x8xf32, #tpu.memory_space<vmem>>, %arg3: memref<240x24xf32, #tpu.memory_space<vmem>>, %arg4: memref<8x240xf32, #tpu.memory_space<vmem>>, %arg5: memref<24x240xf32, #tpu.memory_space<vmem>>, %arg6: memref<16x240xf32, #tpu.memory_space<vmem>>) attributes {dimension_semantics = [#tpu.dimension_semantics<parallel>], iteration_bounds = array<i64: 1>, scalar_prefetch = 0 : i64, scratch_operands = 0 : i64, tpu.core_type = #tpu.core_type<tc>, window_params = [{transform_indices = @transform_0, window_bounds = array<i64: 16, 240>}, {pipeline_mode = #tpu.pipeline_mode<synchronous>, transform_indices = @transform_1, window_bounds = array<i64: 240, 8>}, {pipeline_mode = #tpu.pipeline_mode<synchronous>, transform_indices = @transform_2, window_bounds = array<i64: 240, 24>}, {pipeline_mode = #tpu.pipeline_mode<synchronous>, transform_indices = @transform_3, window_bounds = array<i64: 8, 240>}, {pipeline_mode = #tpu.pipeline_mode<synchronous>, transform_indices = @transform_4, window_bounds = array<i64: 24, 240>}, {transform_indices = @transform_5, window_bounds = array<i64: 16, 240>}]} {
    %c0 = arith.constant 0 : index
    %c0_0 = arith.constant 0 : index
    %0 = vector.load %arg1[%c0, %c0_0] : memref<16x240xf32, #tpu.memory_space<vmem>>, vector<16x240xf32>
    %1 = arith.mulf %0, %0 : vector<16x240xf32>
    %c0_1 = arith.constant 0 : index
    %c0_2 = arith.constant 0 : index
    %2 = vector.load %arg2[%c0_1, %c0_2] : memref<240x8xf32, #tpu.memory_space<vmem>>, vector<240x8xf32>
    %cst = arith.constant dense<0.000000e+00> : vector<16x8xf32>
    %3 = tpu.matmul %0, %2, %cst {dimension_numbers = #tpu.dot_dimension_numbers<[1], [0], [0], [1], [0, 0, 1, 1], [], []>} : vector<16x240xf32>, vector<240x8xf32>, vector<16x8xf32> -> vector<16x8xf32>
    %c0_3 = arith.constant 0 : index
    %c0_4 = arith.constant 0 : index
    %4 = vector.load %arg3[%c0_3, %c0_4] : memref<240x24xf32, #tpu.memory_space<vmem>>, vector<240x24xf32>
    %cst_5 = arith.constant dense<0.000000e+00> : vector<16x24xf32>
    %5 = tpu.matmul %1, %4, %cst_5 {dimension_numbers = #tpu.dot_dimension_numbers<[1], [0], [0], [1], [0, 0, 1, 1], [], []>} : vector<16x240xf32>, vector<240x24xf32>, vector<16x24xf32> -> vector<16x24xf32>
    %6 = vector.extract_strided_slice %5 {offsets = [0, 0], sizes = [16, 8], strides = [1, 1]} : vector<16x24xf32> to vector<16x8xf32>
    %7 = arith.mulf %3, %3 : vector<16x8xf32>
    %8 = arith.subf %6, %7 : vector<16x8xf32>
    %cst_6 = arith.constant 0.000000e+00 : f32
    %9 = vector.broadcast %cst_6 : f32 to vector<16x8xf32>
    %10 = arith.maximumf %8, %9 : vector<16x8xf32>
    %cst_7 = arith.constant 9.99999997E-7 : f32
    %11 = vector.broadcast %cst_7 : f32 to vector<16x8xf32>
    %12 = arith.addf %10, %11 : vector<16x8xf32>
    %13 = math.rsqrt %12 : vector<16x8xf32>
    %14 = vector.extract_strided_slice %5 {offsets = [0, 8], sizes = [16, 8], strides = [1, 1]} : vector<16x24xf32> to vector<16x8xf32>
    %cst_8 = arith.constant 9.99999997E-7 : f32
    %15 = vector.broadcast %cst_8 : f32 to vector<16x8xf32>
    %16 = arith.addf %14, %15 : vector<16x8xf32>
    %17 = math.rsqrt %16 : vector<16x8xf32>
    %18 = vector.extract_strided_slice %5 {offsets = [0, 16], sizes = [16, 8], strides = [1, 1]} : vector<16x24xf32> to vector<16x8xf32>
    %cst_9 = arith.constant 9.99999997E-7 : f32
    %19 = vector.broadcast %cst_9 : f32 to vector<16x8xf32>
    %20 = arith.addf %18, %19 : vector<16x8xf32>
    %21 = math.rsqrt %20 : vector<16x8xf32>
    %22 = tpu.concatenate %13, %17, %21 in 1 : vector<16x8xf32>, vector<16x8xf32>, vector<16x8xf32> -> vector<16x24xf32>
    %c0_10 = arith.constant 0 : index
    %c0_11 = arith.constant 0 : index
    %23 = vector.load %arg5[%c0_10, %c0_11] : memref<24x240xf32, #tpu.memory_space<vmem>>, vector<24x240xf32>
    %cst_12 = arith.constant dense<0.000000e+00> : vector<16x240xf32>
    %24 = tpu.matmul %22, %23, %cst_12 {dimension_numbers = #tpu.dot_dimension_numbers<[1], [0], [0], [1], [0, 0, 1, 1], [], []>} : vector<16x24xf32>, vector<24x240xf32>, vector<16x240xf32> -> vector<16x240xf32>
    %c0_13 = arith.constant 0 : index
    %c0_14 = arith.constant 0 : index
    %25 = vector.load %arg4[%c0_13, %c0_14] : memref<8x240xf32, #tpu.memory_space<vmem>>, vector<8x240xf32>
    %cst_15 = arith.constant dense<0.000000e+00> : vector<16x240xf32>
    %26 = tpu.matmul %3, %25, %cst_15 {dimension_numbers = #tpu.dot_dimension_numbers<[1], [0], [0], [1], [0, 0, 1, 1], [], []>} : vector<16x8xf32>, vector<8x240xf32>, vector<16x240xf32> -> vector<16x240xf32>
    %27 = arith.subf %0, %26 : vector<16x240xf32>
    %28 = arith.mulf %27, %24 : vector<16x240xf32>
    %c0_16 = arith.constant 0 : index
    %c0_17 = arith.constant 0 : index
    %29 = vector.load %arg6[%c0_16, %c0_17] : memref<16x240xf32, #tpu.memory_space<vmem>>, vector<16x240xf32>
    tpu.vector_store %arg6[%c0_16, %c0_17], %28 {strides = array<i32>} : memref<16x240xf32, #tpu.memory_space<vmem>>, vector<16x240xf32>,
    return
  }
  func.func @transform_0(%arg0: i32) -> (i32, i32) {
    %c0_i32 = arith.constant 0 : i32
    %c0_i32_0 = arith.constant 0 : i32
    return %arg0, %c0_i32 : i32, i32
  }
  func.func @transform_1(%arg0: i32) -> (i32, i32) {
    %c0_i32 = arith.constant 0 : i32
    %c0_i32_0 = arith.constant 0 : i32
    %c0_i32_1 = arith.constant 0 : i32
    return %c0_i32, %c0_i32_0 : i32, i32
  }
  func.func @transform_2(%arg0: i32) -> (i32, i32) {
    %c0_i32 = arith.constant 0 : i32
    %c0_i32_0 = arith.constant 0 : i32
    %c0_i32_1 = arith.constant 0 : i32
    return %c0_i32, %c0_i32_0 : i32, i32
  }
  func.func @transform_3(%arg0: i32) -> (i32, i32) {
    %c0_i32 = arith.constant 0 : i32
    %c0_i32_0 = arith.constant 0 : i32
    %c0_i32_1 = arith.constant 0 : i32
    return %c0_i32, %c0_i32_0 : i32, i32
  }
  func.func @transform_4(%arg0: i32) -> (i32, i32) {
    %c0_i32 = arith.constant 0 : i32
    %c0_i32_0 = arith.constant 0 : i32
    %c0_i32_1 = arith.constant 0 : i32
    return %c0_i32, %c0_i32_0 : i32, i32
  }
  func.func @transform_5(%arg0: i32) -> (i32, i32) {
    %c0_i32 = arith.constant 0 : i32
    %c0_i32_0 = arith.constant 0 : i32
    return %arg0, %c0_i32 : i32, i32
  }
}

</mosaic_0001>

<bundles_post_ra>
// kernel: tpu_custom_call.1
= control target key start
LH: loop header
LB: loop body
LE: loop exit
PB: predicated region body
PF: predicated region fallthrough
CT: control target
= control target key end

     0   :  { %v614_v3 = vmov 0.0|0.0   ;;  %vm59_vm0 = vcmask 916480   ;;  %s941_s0 = inlined_call_operand.vmem [shape: f32[16,240], index: 0, kind: input, shape index: {}]   ;;  %s942_s1 = inlined_call_operand.vmem [shape: f32[240,8], index: 1, kind: input, shape index: {}]   ;;  %s943_s2 = inlined_call_operand.vmem [shape: f32[240,24], index: 2, kind: input, shape index: {}]   ;;  %s944_s3 = inlined_call_operand.vmem [shape: f32[8,240], index: 3, kind: input, shape index: {}]   ;;  %s945_s4 = inlined_call_operand.vmem [shape: f32[24,240], index: 4, kind: input, shape index: {}]   ;;  %s946_s5 = inlined_call_operand.hbm [shape: f32[16,240], index: 5, kind: output, shape index: {}]  }
   0x1   :  { %v29_v0 = vld [vmem:[%s942_s1] sm:$0xff]  ;;  %v30_v1 = vld [vmem:[%s942_s1 + $0x8] sm:$0xff]  ;;  %483 = vmatprep.subr.bf16.mxu0 %v614_v3  ;;  %528 = vmatprep.subr.bf16.mxu1 %v614_v3  ;;  %v31_v6 = vld [vmem:[%s942_s1 + $0x10] sm:$0xff] }
   0x2   :  { %v141_v2 = vld [vmem:[%s943_s2] sm:$0xff]  ;;  %v484_v4 = vpack.c.bf16 %v30_v1, %v29_v0  ;;  %v142_v5 = vld [vmem:[%s943_s2 + $0x8] sm:$0xff]  ;;  %v32_v7 = vld [vmem:[%s942_s1 + $0x18] sm:$0xff] }
   0x3   :  { %v529_v8 = vpack.c.bf16 %v142_v5, %v141_v2  ;;  %v143_v9 = vld [vmem:[%s943_s2 + $0x10] sm:$0xff]  ;;  %v144_v10 = vld [vmem:[%s943_s2 + $0x18] sm:$0xff]  ;;  %v487_v11 = vpack.c.bf16 %v32_v7, %v31_v6  ;;  %v33_v13 = vld [vmem:[%s942_s1 + $0x20] sm:$0xff] }
   0x4   :  { %485 = vmatpush1.bf16.msra.mxu0 %v484_v4  ;;  %v532_v12 = vpack.c.bf16 %v144_v10, %v143_v9  ;;  %v34_v14 = vld [vmem:[%s942_s1 + $0x28] sm:$0xff]  ;;  %v145_v15 = vld [vmem:[%s943_s2 + $0x20] sm:$0xff]  ;;  %v35_v19 = vld [vmem:[%s942_s1 + $0x30] sm:$0xff] }
   0x5   :  { %530 = vmatpush1.bf16.msra.mxu1 %v529_v8  ;;  %486 = vmatprep.subr.bf16.mxu0 %v614_v3  ;;  %v146_v16 = vld [vmem:[%s943_s2 + $0x28] sm:$0xff]  ;;  %v490_v17 = vpack.c.bf16 %v34_v14, %v33_v13  ;;  %v36_v20 = vld [vmem:[%s942_s1 + $0x38] sm:$0xff]  ;;  %v147_v21 = vld [vmem:[%s943_s2 + $0x30] sm:$0xff] }
   0x6   :  { %531 = vmatprep.subr.bf16.mxu1 %v614_v3  ;;  %v535_v18 = vpack.c.bf16 %v146_v16, %v145_v15  ;;  %v148_v22 = vld [vmem:[%s943_s2 + $0x38] sm:$0xff]  ;;  %v493_v23 = vpack.c.bf16 %v36_v20, %v35_v19  ;;  %v37_v25 = vld [vmem:[%s942_s1 + $0x40] sm:$0xff]  ;;  %v38_v26 = vld [vmem:[%s942_s1 + $0x48] sm:$0xff] }
   0x7   :  { %v538_v24 = vpack.c.bf16 %v148_v22, %v147_v21  ;;  %v149_v27 = vld [vmem:[%s943_s2 + $0x40] sm:$0xff]  ;;  %v150_v28 = vld [vmem:[%s943_s2 + $0x48] sm:$0xff]  ;;  %v496_v29 = vpack.c.bf16 %v38_v26, %v37_v25  ;;  %v39_v31 = vld [vmem:[%s942_s1 + $0x50] sm:$0xff] }
   0x8   :  { %488 = vmatpush1.bf16.msra.mxu0 %v487_v11  ;;  %v541_v30 = vpack.c.bf16 %v150_v28, %v149_v27  ;;  %v40_v32 = vld [vmem:[%s942_s1 + $0x58] sm:$0xff]  ;;  %v151_v33 = vld [vmem:[%s943_s2 + $0x50] sm:$0xff]  ;;  %v41_v37 = vld [vmem:[%s942_s1 + $0x60] sm:$0xff] }
   0x9   :  { %533 = vmatpush1.bf16.msra.mxu1 %v532_v12  ;;  %489 = vmatprep.subr.bf16.mxu0 %v614_v3  ;;  %v152_v34 = vld [vmem:[%s943_s2 + $0x58] sm:$0xff]  ;;  %v499_v35 = vpack.c.bf16 %v40_v32, %v39_v31  ;;  %v42_v38 = vld [vmem:[%s942_s1 + $0x68] sm:$0xff]  ;;  %v153_v40 = vld [vmem:[%s943_s2 + $0x60] sm:$0xff] }
   0xa   :  { %534 = vmatprep.subr.bf16.mxu1 %v614_v3  ;;  %v544_v36 = vpack.c.bf16 %v152_v34, %v151_v33  ;;  %v741_v39 = vld [vmem:[%s941_s0 + $0x8] sm:$0xff] }
   0xb   :  { %v154_v41 = vld [vmem:[%s943_s2 + $0x68] sm:$0xff]  ;;  %475 = vmatprep.mubr.msk.f32.mxu0 %vm59_vm0, %v741_v39  ;;  %v26_v42 = vmul.f32 %v741_v39, %v741_v39 }
   0xc   :  { %491 = vmatpush1.bf16.msra.mxu0 %v490_v17 }
   0xd   :  { %536 = vmatpush1.bf16.msra.mxu1 %v535_v18  ;;  %492 = vmatprep.subr.bf16.mxu0 %v614_v3 }
   0xe   :  { %537 = vmatprep.subr.bf16.mxu1 %v614_v3 }
  0x10   :  { %494 = vmatpush1.bf16.msra.mxu0 %v493_v23 }
  0x11   :  { %539 = vmatpush1.bf16.msra.mxu1 %v538_v24  ;;  %495 = vmatprep.subr.bf16.mxu0 %v614_v3 }
  0x12   :  { %540 = vmatprep.subr.bf16.mxu1 %v614_v3 }
  0x14   :  { %497 = vmatpush1.bf16.msra.mxu0 %v496_v29 }
  0x15   :  { %542 = vmatpush1.bf16.msra.mxu1 %v541_v30  ;;  %498 = vmatprep.subr.bf16.mxu0 %v614_v3 }
  0x16   :  { %543 = vmatprep.subr.bf16.mxu1 %v614_v3 }
  0x17   :  { %10 = vsyncpa [#allocation3], 0  ;;  %v502_v43 = vpack.c.bf16 %v42_v38, %v41_v37  ;;  %477 = vmatprep.mubr.msk.f32.mxu1 %vm59_vm0, %v26_v42  ;;  %v547_v44 = vpack.c.bf16 %v154_v41, %v153_v40  ;;  %v43_v45 = vld [vmem:[%s942_s1 + $0x70] sm:$0xff]  ;;  %v44_v46 = vld [vmem:[%s942_s1 + $0x78] sm:$0xff]  ;;  %v615_v37 = vmov 0.0   ;;  %vm266_vm1 = vcmask 64512  }
  0x18   :  { %500 = vmatpush1.bf16.msra.mxu0 %v499_v35  ;;  %v155_v47 = vld [vmem:[%s943_s2 + $0x70] sm:$0xff]  ;;  %v156_v48 = vld [vmem:[%s943_s2 + $0x78] sm:$0xff]  ;;  %v505_v49 = vpack.c.bf16 %v44_v46, %v43_v45  ;;  %v45_v51 = vld [vmem:[%s942_s1 + $0x80] sm:$0xff]  ;;  %vm269_vm2 = vcmask 130048   ;;  %vm278_vm3 = vcmask 195584  }
  0x19   :  { %545 = vmatpush1.bf16.msra.mxu1 %v544_v36  ;;  %501 = vmatprep.subr.bf16.mxu0 %v614_v3  ;;  %v550_v50 = vpack.c.bf16 %v156_v48, %v155_v47  ;;  %v46_v52 = vld [vmem:[%s942_s1 + $0x88] sm:$0xff]  ;;  %v157_v53 = vld [vmem:[%s943_s2 + $0x80] sm:$0xff]  ;;  %v47_v57 = vld [vmem:[%s942_s1 + $0x90] sm:$0xff] }
  0x1a   :  { %546 = vmatprep.subr.bf16.mxu1 %v614_v3  ;;  %v158_v54 = vld [vmem:[%s943_s2 + $0x88] sm:$0xff]  ;;  %v508_v55 = vpack.c.bf16 %v46_v52, %v45_v51  ;;  %v48_v58 = vld [vmem:[%s942_s1 + $0x98] sm:$0xff]  ;;  %v159_v59 = vld [vmem:[%s943_s2 + $0x90] sm:$0xff] }
  0x1b   :  { %v553_v56 = vpack.c.bf16 %v158_v54, %v157_v53  ;;  %v160_v60 = vld [vmem:[%s943_s2 + $0x98] sm:$0xff]  ;;  %v511_v61 = vpack.c.bf16 %v48_v58, %v47_v57  ;;  %v49_v63 = vld [vmem:[%s942_s1 + $0xa0] sm:$0xff]  ;;  %v50_v0 = vld [vmem:[%s942_s1 + $0xa8] sm:$0xff] }
  0x1c   :  { %503 = vmatpush1.bf16.msra.mxu0 %v502_v43  ;;  %v556_v62 = vpack.c.bf16 %v160_v60, %v159_v59  ;;  %v161_v1 = vld [vmem:[%s943_s2 + $0xa0] sm:$0xff]  ;;  %v162_v2 = vld [vmem:[%s943_s2 + $0xa8] sm:$0xff]  ;;  %v514_v4 = vpack.c.bf16 %v50_v0, %v49_v63  ;;  %v51_v6 = vld [vmem:[%s942_s1 + $0xb0] sm:$0xff] }
  0x1d   :  { %548 = vmatpush1.bf16.msra.mxu1 %v547_v44  ;;  %504 = vmatprep.subr.bf16.mxu0 %v614_v3  ;;  %v559_v5 = vpack.c.bf16 %v162_v2, %v161_v1  ;;  %v52_v7 = vld [vmem:[%s942_s1 + $0xb8] sm:$0xff]  ;;  %v163_v8 = vld [vmem:[%s943_s2 + $0xb0] sm:$0xff]  ;;  %v53_v12 = vld [vmem:[%s942_s1 + $0xc0] sm:$0xff] }
  0x1e   :  { %549 = vmatprep.subr.bf16.mxu1 %v614_v3  ;;  %v164_v9 = vld [vmem:[%s943_s2 + $0xb8] sm:$0xff]  ;;  %v517_v10 = vpack.c.bf16 %v52_v7, %v51_v6  ;;  %v54_v13 = vld [vmem:[%s942_s1 + $0xc8] sm:$0xff]  ;;  %v165_v14 = vld [vmem:[%s943_s2 + $0xc0] sm:$0xff] }
  0x1f   :  { %v562_v11 = vpack.c.bf16 %v164_v9, %v163_v8  ;;  %v166_v15 = vld [vmem:[%s943_s2 + $0xc8] sm:$0xff]  ;;  %v520_v16 = vpack.c.bf16 %v54_v13, %v53_v12  ;;  %v55_v18 = vld [vmem:[%s942_s1 + $0xd0] sm:$0xff]  ;;  %v56_v19 = vld [vmem:[%s942_s1 + $0xd8] sm:$0xff] }
  0x20   :  { %506 = vmatpush1.bf16.msra.mxu0 %v505_v49  ;;  %v565_v17 = vpack.c.bf16 %v166_v15, %v165_v14  ;;  %v167_v20 = vld [vmem:[%s943_s2 + $0xd0] sm:$0xff]  ;;  %v168_v21 = vld [vmem:[%s943_s2 + $0xd8] sm:$0xff]  ;;  %v523_v22 = vpack.c.bf16 %v56_v19, %v55_v18  ;;  %v57_v24 = vld [vmem:[%s942_s1 + $0xe0] sm:$0xff] }
  0x21   :  { %551 = vmatpush1.bf16.msra.mxu1 %v550_v50  ;;  %507 = vmatprep.subr.bf16.mxu0 %v614_v3  ;;  %v568_v23 = vpack.c.bf16 %v168_v21, %v167_v20  ;;  %v58_v25 = vld [vmem:[%s942_s1 + $0xe8] sm:$0xff]  ;;  %v169_v26 = vld [vmem:[%s943_s2 + $0xe0] sm:$0xff]  ;;  %v877_v31 = vld [vmem:[%s941_s0 + $0x18] sm:$0xff] }
  0x22   :  { %552 = vmatprep.subr.bf16.mxu1 %v614_v3  ;;  %v170_v27 = vld [vmem:[%s943_s2 + $0xe8] sm:$0xff]  ;;  %v526_v28 = vpack.c.bf16 %v58_v25, %v57_v24  ;;  %v871_v30 = vld [vmem:[%s941_s0] sm:$0xff]  ;;  %v28_v34 = vmul.f32 %v877_v31, %v877_v31  ;;  %v275_v40 = vld [vmem:[%s945_s4 + $0x18] sm:$0xff] }
  0x23   :  { %v571_v29 = vpack.c.bf16 %v170_v27, %v169_v26  ;;  %v363_v32 = vld [vmem:[%s944_s3 + $0x8] sm:$0xff]  ;;  %v25_v33 = vmul.f32 %v871_v30, %v871_v30  ;;  %v362_v36 = vld [vmem:[%s944_s3] sm:$0xff]  ;;  %v274_v43 = vld [vmem:[%s945_s4 + $0x10] sm:$0xff] }
  0x24   :  { %509 = vmatpush1.bf16.msra.mxu0 %v508_v55  ;;  %v273_v38 = vld [vmem:[%s945_s4 + $0x8] sm:$0xff]  ;;  %v272_v41 = vld [vmem:[%s945_s4] sm:$0xff] }
  0x25   :  { %554 = vmatpush1.bf16.msra.mxu1 %v553_v56  ;;  %510 = vmatprep.subr.bf16.mxu0 %v614_v3  ;;  %v573_v42 = vpack.c.bf16 %v275_v40, %v273_v38  ;;  %v575_v44 = vpack.c.bf16 %v274_v43, %v272_v41  ;;  %v277_v45 = vld [vmem:[%s945_s4 + $0x28] sm:$0xff]  ;;  %v276_v46 = vld [vmem:[%s945_s4 + $0x20] sm:$0xff]  ;;  %s616_s4 = smov [#allocation2]  }
  0x26   :  { %555 = vmatprep.subr.bf16.mxu1 %v614_v3  ;;  %s464_s8 = sshll.u32 %s616_s4, 4  ;;  %s465_s8 = int_to_ptr.vmem [resolvable:$true] %s464_s8 }
  0x27   :  { %s590_s9 = scalar_lea.vmem %s465_s8, 512  ;;  %p595_p1 = scmp.lt.s32.totalorder %s465_s8, %s465_s8 }
  0x28   :  { %512 = vmatpush1.bf16.msra.mxu0 %v511_v61  ;;  %p591_p0 = scmp.ne.s32.totalorder %s465_s8, %s590_s9  ;;  %p596_p2 = scmp.lt.s32.totalorder %s590_s9, %s590_s9 }
  0x29   :  { %557 = vmatpush1.bf16.msra.mxu1 %v556_v62  ;;  %513 = vmatprep.subr.bf16.mxu0 %v614_v3 }
  0x2a   :  { %558 = vmatprep.subr.bf16.mxu1 %v614_v3  ;;  %p597_p3 = por %p596_p2, %p595_p1 }
  0x2c   :  { %515 = vmatpush1.bf16.msra.mxu0 %v514_v4  ;;  %p598_p4 = pnand %p597_p3, %p591_p0 }
  0x2d   :  { %560 = vmatpush1.bf16.msra.mxu1 %v559_v5  ;;  %516 = vmatprep.subr.bf16.mxu0 %v614_v3 }
  0x2e   :  { %561 = vmatprep.subr.bf16.mxu1 %v614_v3 }
  0x30   :  { %518 = vmatpush1.bf16.msra.mxu0 %v517_v10 }
  0x31   :  { %563 = vmatpush1.bf16.msra.mxu1 %v562_v11  ;;  %519 = vmatprep.subr.bf16.mxu0 %v614_v3 }
  0x32   :  { %564 = vmatprep.subr.bf16.mxu1 %v614_v3 }
  0x34   :  { %521 = vmatpush1.bf16.msra.mxu0 %v520_v16 }
  0x35   :  { %566 = vmatpush1.bf16.msra.mxu1 %v565_v17  ;;  %522 = vmatprep.subr.bf16.mxu0 %v614_v3 }
  0x36   :  { %567 = vmatprep.subr.bf16.mxu1 %v614_v3 }
  0x38   :  { %524 = vmatpush1.bf16.msra.mxu0 %v523_v22 }
  0x39   :  { %569 = vmatpush1.bf16.msra.mxu1 %v568_v23  ;;  %525 = vmatprep.subr.bf16.mxu0 %v614_v3 }
  0x3a   :  { %570 = vmatprep.subr.bf16.mxu1 %v614_v3  ;;  %v889_v3 = vld [vmem:[%s941_s0 + $0x10] sm:$0xff] }
  0x3b   :  { %v27_v35 = vmul.f32 %v889_v3, %v889_v3 }
  0x3c   :  { %527 = vmatpush1.bf16.msra.mxu0 %v526_v28 }
  0x3d   :  { %572 = vmatpush1.bf16.msra.mxu1 %v571_v29  ;;  %574 = vmatprep.subr.bf16.mxu0 %v573_v42 }
  0x3e   :  { %370 = vmatprep.subr.mxu1 %v363_v32 }
  0x3f   :  { %131 = vmatmul.mubr.f32.vlgmr.msra.gmra.mrb[0].mxu0 %v871_v30 }
  0x40   :  { %242 = vmatmul.mubr.f32.vlgmr.msra.gmra.mrb[0].mxu1 %v25_v33  ;;  %476 = vmatprep.mubr.msk.f32.mxu0 %vm59_vm0, %v877_v31 }
  0x41   :  { %478 = vmatprep.mubr.msk.f32.mxu1 %vm59_vm0, %v28_v34  ;;  %371 = vmatpush1.msra.mxu1 %v362_v36 }
  0x42   :  { %576 = vmatpush1.bf16.msra.mxu0 %v575_v44 }
  0x43   :  { %136 = vmatmul.mubr.f32.gmra.mrb[2].mxu0 %v889_v3  ;;  %289 = vmatprep.subr.mxu0 %v277_v45 }
  0x44   :  { %247 = vmatmul.mubr.f32.gmra.mrb[2].mxu1 %v27_v35  ;;  %349 = vmatprep.mubr.f32.mxu0 %v615_v37 }
  0x45   :  { %434 = vmatprep.mubr.f32.mxu1 %v615_v37 }
  0x46   :  { %290 = vmatpush1.msra.mxu0 %v276_v46 }
 0x112   :  { %v132_v47 = vpop.f32.mrb[0].mxu0 }
 0x113   :  { %v252_v48 = vmul.f32 %v132_v47, %v132_v47  ;;  %v134_v49 = vpop.f32.mrb[1].mxu0  ;;  %v243_v50 = vpop.f32.mrb[0].mxu1  ;;  %481 = vmatmul.mubr.msk.f32.vlgmr.msra.gmra.mrb[4].mxu1 %vm266_vm1, %v132_v47 }
 0x114   :  { %v245_v51 = vpop.f32.mrb[1].mxu1  ;;  %440 = vmatprep.mubr.f32.mxu1 %v615_v37  ;;  %v262_v53 = vadd.f32 1e-06, %v243_v50 }
 0x115   :  { %v254_v52 = vsub.f32 %v243_v50, %v252_v48 }
 0x116   :  { %v137_v54 = vpop.f32.mrb[2].mxu0  ;;  %582 = vrsqrt.f32 %v262_v53 }
 0x117   :  { %v256_v55 = vmax.f32 %v254_v52, 0.0  ;;  %v253_v56 = vmul.f32 %v137_v54, %v137_v54  ;;  %v139_v57 = vpop.f32.mrb[3].mxu0  ;;  %v248_v58 = vpop.f32.mrb[2].mxu1  ;;  %482 = vmatmul.mubr.msk.f32.gmra.mrb[6].mxu1 %vm266_vm1, %v137_v54 }
 0x118   :  { %v250_v59 = vpop.f32.mrb[3].mxu1  ;;  %v263_v62 = vadd.f32 1e-06, %v248_v58 }
 0x119   :  { %v258_v60 = vadd.f32 1e-06, %v256_v55  ;;  %v255_v61 = vsub.f32 %v248_v58, %v253_v56 }
 0x11b   :  { %584 = vrsqrt.f32 %v258_v60  ;;  %v257_v63 = vmax.f32 %v255_v61, 0.0 }
 0x11c   :  { %586 = vrsqrt.f32 %v263_v62 }
 0x11d   :  { %v259_v0 = vadd.f32 1e-06, %v257_v63 }
 0x11f   :  { %588 = vrsqrt.f32 %v259_v0 }
 0x120   :  { %v583_v1 = vpop.eup %582 }
 0x125   :  { %v585_v2 = vpop.eup %584 }
 0x126   :  { %v267_v4 = vsel %vm266_vm1, %v585_v2, %v583_v1  ;;  %v587_v6 = vpop.eup %586 }
 0x127   :  { %v270_v5 = vsel %vm269_vm2, %v267_v4, %v583_v1 }
 0x128   :  { %479 = vmatmul.mubr.msk.f32.vlgmr.msra.gmra.mrb[4].mxu0 %vm278_vm3, %v270_v5 }
 0x129   :  { %v589_v7 = vpop.eup %588  ;;  %355 = vmatprep.mubr.f32.mxu0 %v615_v37 }
 0x12a   :  { %v268_v8 = vsel %vm266_vm1, %v589_v7, %v587_v6 }
 0x12b   :  { %v271_v9 = vsel %vm269_vm2, %v268_v8, %v587_v6 }
 0x12c   :  { %480 = vmatmul.mubr.msk.f32.gmra.mrb[6].mxu0 %vm278_vm3, %v271_v9 }
 0x1e6   :  { %v436_v10 = vpop.f32.mrb[4].mxu1 }
 0x1e7   :  { %v438_v11 = vpop.f32.mrb[5].mxu1  ;;  %v447_v14 = vsub.f32 %v871_v30, %v436_v10 }
 0x1e8   :  { %v448_v15 = vsub.f32 %v741_v39, %v438_v11 }
 0x1ea   :  { %v442_v12 = vpop.f32.mrb[6].mxu1 }
 0x1eb   :  { %v444_v13 = vpop.f32.mrb[7].mxu1  ;;  %v449_v20 = vsub.f32 %v889_v3, %v442_v12 }
 0x1ec   :  { %v450_v21 = vsub.f32 %v877_v31, %v444_v13 }
 0x1fb   :  { %v351_v16 = vpop.f32.mrb[4].mxu0 }
 0x1fc   :  { %v451_v17 = vmul.f32 %v447_v14, %v351_v16  ;;  %v353_v18 = vpop.f32.mrb[5].mxu0 }
 0x1fd   :  { %v452_v19 = vmul.f32 %v448_v15, %v353_v18 }
 0x1fe   :  { %455 = vst [vmem:[#allocation2] sm:$0xff] %v451_v17 }
 0x1ff   :  { %456 = vst.msk [vmem:[#allocation2 + $0x8] sm:$0xff] %vm59_vm0, %v452_v19  ;;  %v357_v22 = vpop.f32.mrb[6].mxu0 }
 0x200   :  { %v453_v23 = vmul.f32 %v449_v20, %v357_v22  ;;  %v359_v24 = vpop.f32.mrb[7].mxu0 }
 0x201   :  { %v454_v25 = vmul.f32 %v450_v21, %v359_v24 }
 0x202   :  { %457 = vst [vmem:[#allocation2 + $0x10] sm:$0xff] %v453_v23 }
 0x203   :  { %458 = vst.msk [vmem:[#allocation2 + $0x18] sm:$0xff] %vm59_vm0, %v454_v25 }
 0x204   :  { %601 = shalt.err (!%p598_p4)
}
 0x205   :  { %s602_s12 = scalar_lea.hbm %s946_s5, 512 }
 0x206   :  { %p603_p5 = scmp.ne.s32.totalorder %s946_s5, %s602_s12  ;;  %p606_p6 = scmp.lt.u32.totalorder %s602_s12, %s946_s5 }
 0x208   :  { %p608_p7 = pnand %p606_p6, %p603_p5 }
 0x20a   :  { %611 = shalt.err (!%p608_p7)
}
 0x20b   :  { %s617_s1 = smov 256   ;;  %s618_s17 = smov 16  }
 0x20c   :  { %470 = dma.vmem_to_hbm [thread:$0]  %s465_s8, 512, %s946_s5, [#allocation3], %s617_s1, %s617_s1, %s618_s17  }
 0x20d   :  { %612 = dma.done.wait [#allocation3], 512  }
 0x20e   :  { %613 = vsyncadd [#allocation3], 4294966784 }
 0x20f   :  { %474 = vsyncpa [#allocation3], 1 }

</bundles_post_ra>
